<compile_context>
chip_gen: v7x
topology: tpu7x:2x2x1
jax: 0.10.0
libtpu: 0.0.40
codegen_flags: <defaults>
</compile_context>

<pallas_src>
import math

import jax
import jax.numpy as jnp
from jax import lax
from jax.experimental import pallas as pl
from jax.experimental.pallas import tpu as pltpu


_MAX_LANE_TILE = 2048           # 512-2048 lanes already saturates HBM bandwidth
_VMEM_HEADROOM = 4 * 1024 * 1024


def _vmem_limit_bytes():
    """Scoped-VMEM limit derived from the actual chip (v5e/v6e: 128 MiB physical,
    v7x: 64 MiB per TensorCore); never request more than half the physical."""
    try:
        cap = pltpu.get_tpu_info().vmem_capacity_bytes
    except Exception:           # interpret mode / unknown chip
        cap = 64 * 1024 * 1024
    return min(cap // 2, 64 * 1024 * 1024)


def _pick_lane_tile(n, H, W, cin, cout, n_taps, vmem_limit, out_bytes):
    """Largest lane tile TL that is a multiple of W, divides H*W, is Mosaic-legal
    (multiple of 128 or the full H*W), fits the VMEM data budget, and is capped
    at _MAX_LANE_TILE lanes (bigger tiles do not buy more HBM bandwidth)."""
    L = H * W
    # Resident (replicated) blocks: bf16 conv taps, BN affine, biases, upsample
    # weights; x2 for double buffering.
    resident = 2 * (n_taps * cin * cout * 2 + 2 * cin * 4 + cout * 4
                    + cin * cout * 2 + cout * 4)
    # Bytes live per lane column inside the kernel:
    #   2x double-buffered f32 input tile + 2x output tile          (pipeline)
    #   BN copy + ~n_taps rolled/masked/bf16 tap copies
    #   acc / out / ident f32
    per_lane = cin * (12 + 6 * n_taps) + cout * (2 * out_bytes + 12)
    budget = max(vmem_limit - _VMEM_HEADROOM - resident, 0)
    cap = max(min(budget // per_lane, _MAX_LANE_TILE), 128)

    cands = sorted({t * W for t in range(1, H + 1)
                    if H % t == 0 and ((t * W) % 128 == 0 or t * W == L)})
    fitting = [c for c in cands if c <= cap]
    # TODO(synk): pathological (H, W) with no fitting 128-aligned W-multiple fall
    # back to the smallest legal candidate; pad W to 128 in the wrapper if even
    # that exceeds the VMEM budget.
    if not fitting:
        return cands[0]
    # Prefer >= 2 grid steps (v7x megacore) when a fitting candidate allows it.
    for c in reversed(fitting):
        if n * (L // c) >= 2:
            return c
    return fitting[-1]


def _make_kernel(W, n_taps, has_upsample):
    """Fused BN + (1,5)-conv + bias + ReLU + residual kernel on (Cin, TL) tiles."""

    def kernel(x_ref, scale_ref, shift_ref, w_ref, bc_ref, *rest):
        if has_upsample:
            wu_ref, bu_ref, o_ref = rest
        else:
            (o_ref,) = rest

        x = x_ref[...].astype(jnp.float32)            # (Cin, TL), lanes = W axis
        cin, tl = x.shape
        cout = o_ref.shape[0]

        # BatchNorm2d (inference) folded to a per-channel affine.
        x_bn = x * scale_ref[...] + shift_ref[...]

        # Lane position inside its length-W line -> conv zero-padding mask.
        w_pos = lax.broadcasted_iota(jnp.int32, (1, tl), 1) % W
        half = n_taps // 2

        # (1,5) conv along W: per tap one lane roll (XLU) + edge mask (VALU) +
        # one bf16 MXU push with f32 accumulation.  No (5*Cin, TL) concat
        # temporary is ever materialized (largest live buffer stays (Cin, TL)).
        acc = jnp.zeros((cout, tl), jnp.float32)
        for k in range(n_taps):
            d = k - half                              # tap offset along W
            # Lines are tile-contained (TL % W == 0), so a lane roll == a W
            # shift; out-of-line source positions are masked to zero.
            shifted = x_bn if d == 0 else pltpu.roll(x_bn, (-d) % tl, axis=1)
            src = w_pos + d
            tap = jnp.where((src >= 0) & (src < W), shifted, 0.0)
            acc = acc + jnp.dot(w_ref[k], tap.astype(jnp.bfloat16),
                                preferred_element_type=jnp.float32)

        out = jnp.maximum(acc + bc_ref[...], 0.0)     # conv bias + ReLU

        if has_upsample:                              # residual 1x1 conv (bf16 MXU)
            ident = jnp.dot(wu_ref[...], x.astype(jnp.bfloat16),
                            preferred_element_type=jnp.float32) + bu_ref[...]
        else:
            ident = x
        o_ref[...] = (out + ident).astype(o_ref.dtype)

    return kernel


def time_block_1d(x, params, out_dtype=None):
    """x: (N, Cin, H, W) float32 -> (N, Cout, H, W) (NCHW, like PyTorch).

    out_dtype=jnp.bfloat16 halves the dominant HBM write if the downstream
    consumer tolerates it; the default keeps the input dtype (f32)."""
    n, cin, h, w = x.shape
    conv_w = params["conv_w"]                         # (Cout, Cin, 1, 5)
    cout, _, _, n_taps = conv_w.shape
    has_up = "up_w" in params
    if not has_up:
        assert cin == cout, "residual without upsample requires ins == outs"
    out_dtype = x.dtype if out_dtype is None else out_dtype
    eps = 1e-5

    # Fold eval-mode BatchNorm2d into a per-channel affine.
    scale1 = params["bn_gamma"] / jnp.sqrt(params["bn_var"] + eps)
    scale = scale1.reshape(cin, 1).astype(jnp.float32)
    shift = (params["bn_beta"] - params["bn_mean"] * scale1
             ).reshape(cin, 1).astype(jnp.float32)
    conv_b = params["conv_b"].reshape(cout, 1).astype(jnp.float32)

    # (n_taps, Cout, Cin) bf16 tap weights -> per-tap MXU pushes in the kernel.
    w_kern = jnp.transpose(conv_w[:, :, 0, :], (2, 0, 1)).astype(jnp.bfloat16)

    # Free reshape only (no HBM transpose pass): (N, Cin, H, W) -> (N, Cin, H*W).
    L = h * w
    x3 = x.reshape(n, cin, L)
    vmem_limit = _vmem_limit_bytes()
    tl = _pick_lane_tile(n, h, w, cin, cout, n_taps, vmem_limit,
                         jnp.dtype(out_dtype).itemsize)
    grid = (n, L // tl)

    def rep(shape):
        return pl.BlockSpec(shape, lambda ni, li, _s=shape: (0,) * len(_s))

    in_specs = [
        pl.BlockSpec((None, cin, tl), lambda ni, li: (ni, 0, li)),
        rep((cin, 1)),
        rep((cin, 1)),
        rep((n_taps, cout, cin)),
        rep((cout, 1)),
    ]
    args = [x3, scale, shift, w_kern, conv_b]
    if has_up:
        up_w = params["up_w"][:, :, 0, 0].astype(jnp.bfloat16)    # (Cout, Cin)
        up_b = params["up_b"].reshape(cout, 1).astype(jnp.float32)
        in_specs += [rep((cout, cin)), rep((cout, 1))]
        args += [up_w, up_b]

    out3 = pl.pallas_call(
        _make_kernel(w, n_taps, has_up),
        out_shape=jax.ShapeDtypeStruct((n, cout, L), out_dtype),
        grid=grid,
        in_specs=in_specs,
        out_specs=pl.BlockSpec((None, cout, tl), lambda ni, li: (ni, 0, li)),
        compiler_params=pltpu.CompilerParams(
            dimension_semantics=("parallel", "parallel"),
            vmem_limit_bytes=vmem_limit),
    )(*args)

    return out3.reshape(n, cout, h, w)


def init_params(key, ins, outs, ksize=5):
    """Deterministic synthetic parameters matching TimeBlock1D.__init__ shapes."""
    ks = jax.random.split(key, 8)
    p = {
        "bn_gamma": jax.random.uniform(ks[0], (ins,), jnp.float32, 0.5, 1.5),
        "bn_beta": jax.random.normal(ks[1], (ins,), jnp.float32) * 0.1,
        "bn_mean": jax.random.normal(ks[2], (ins,), jnp.float32) * 0.1,
        "bn_var": jax.random.uniform(ks[3], (ins,), jnp.float32, 0.5, 1.5),
        "conv_w": jax.random.normal(ks[4], (outs, ins, 1, ksize), jnp.float32)
                  / math.sqrt(ins * ksize),
        "conv_b": jax.random.normal(ks[5], (outs,), jnp.float32) * 0.05,
    }
    if ins != outs:
        p["up_w"] = jax.random.normal(ks[6], (outs, ins, 1, 1), jnp.float32) / math.sqrt(ins)
        p["up_b"] = jax.random.normal(ks[7], (outs,), jnp.float32) * 0.05
    return p


def reference(x, params):
    """Pure-JAX reference of the PyTorch forward (eval-mode BN)."""
    eps = 1e-5
    rm = params["bn_mean"][None, :, None, None]
    rv = params["bn_var"][None, :, None, None]
    g = params["bn_gamma"][None, :, None, None]
    b = params["bn_beta"][None, :, None, None]
    xb = (x - rm) / jnp.sqrt(rv + eps) * g + b
    out = lax.conv_general_dilated(
        xb, params["conv_w"], window_strides=(1, 1), padding=((0, 0), (2, 2)),
        dimension_numbers=("NCHW", "OIHW", "NCHW"),
        precision=lax.Precision.HIGHEST) + params["conv_b"][None, :, None, None]
    out = jnp.maximum(out, 0.0)
    if "up_w" in params:
        ident = lax.conv_general_dilated(
            x, params["up_w"], (1, 1), "VALID",
            dimension_numbers=("NCHW", "OIHW", "NCHW"),
            precision=lax.Precision.HIGHEST) + params["up_b"][None, :, None, None]
    else:
        ident = x
    return out + ident


if __name__ == "__main__":
    key = jax.random.PRNGKey(0)
    kx1, kp1, kx2, kp2 = jax.random.split(key, 4)

    # Case 1: ins != outs -> residual through the 1x1 upsample conv (bf16 MXU).
    N, Cin, Cout, H, W = 2, 4, 8, 8, 16
    x = jax.random.normal(kx1, (N, Cin, H, W), jnp.float32)
    params = init_params(kp1, Cin, Cout)
    y = jax.block_until_ready(time_block_1d(x, params))
    y_ref = reference(x, params)
    assert y.shape == (N, Cout, H, W)
    err = float(jnp.max(jnp.abs(y - y_ref)))
    assert jnp.allclose(y, y_ref, atol=2e-2, rtol=2e-2), err

    # Case 2: ins == outs -> plain residual.
    x2 = jax.random.normal(kx2, (N, Cout, H, W), jnp.float32)
    params2 = init_params(kp2, Cout, Cout)
    y2 = jax.block_until_ready(time_block_1d(x2, params2))
    y2_ref = reference(x2, params2)
    err2 = float(jnp.max(jnp.abs(y2 - y2_ref)))
    assert jnp.allclose(y2, y2_ref, atol=2e-2, rtol=2e-2), err2

    print("KERNEL_OK")
</pallas_src>

<mosaic_0001>
module attributes {stable_mosaic.version = 11 : i64} {
  func.func @kernel(%arg0: i32, %arg1: i32, %arg2: memref<1x4x128xf32, #tpu.memory_space<vmem>>, %arg3: memref<4x1xf32, #tpu.memory_space<vmem>>, %arg4: memref<4x1xf32, #tpu.memory_space<vmem>>, %arg5: memref<5x8x4xbf16, #tpu.memory_space<vmem>>, %arg6: memref<8x1xf32, #tpu.memory_space<vmem>>, %arg7: memref<8x4xbf16, #tpu.memory_space<vmem>>, %arg8: memref<8x1xf32, #tpu.memory_space<vmem>>, %arg9: memref<1x8x128xf32, #tpu.memory_space<vmem>>) attributes {dimension_semantics = [#tpu.dimension_semantics<parallel>, #tpu.dimension_semantics<parallel>], iteration_bounds = array<i64: 2, 1>, scalar_prefetch = 0 : i64, scratch_operands = 0 : i64, tpu.core_type = #tpu.core_type<tc>, window_params = [{transform_indices = @transform_0, window_bounds = array<i64: 1, 4, 128>}, {pipeline_mode = #tpu.pipeline_mode<synchronous>, transform_indices = @transform_1, window_bounds = array<i64: 4, 1>}, {pipeline_mode = #tpu.pipeline_mode<synchronous>, transform_indices = @transform_2, window_bounds = array<i64: 4, 1>}, {pipeline_mode = #tpu.pipeline_mode<synchronous>, transform_indices = @transform_3, window_bounds = array<i64: 5, 8, 4>}, {pipeline_mode = #tpu.pipeline_mode<synchronous>, transform_indices = @transform_4, window_bounds = array<i64: 8, 1>}, {pipeline_mode = #tpu.pipeline_mode<synchronous>, transform_indices = @transform_5, window_bounds = array<i64: 8, 4>}, {pipeline_mode = #tpu.pipeline_mode<synchronous>, transform_indices = @transform_6, window_bounds = array<i64: 8, 1>}, {transform_indices = @transform_7, window_bounds = array<i64: 1, 8, 128>}]} {
    %c0 = arith.constant 0 : index
    %c0_0 = arith.constant 0 : index
    %c0_1 = arith.constant 0 : index
    %0 = vector.load %arg2[%c0, %c0_0, %c0_1] : memref<1x4x128xf32, #tpu.memory_space<vmem>>, vector<1x4x128xf32>
    %1 = vector.shape_cast %0 : vector<1x4x128xf32> to vector<4x128xf32>
    %c0_2 = arith.constant 0 : index
    %c0_3 = arith.constant 0 : index
    %2 = vector.load %arg3[%c0_2, %c0_3] : memref<4x1xf32, #tpu.memory_space<vmem>>, vector<4x1xf32>
    %3 = vector.broadcast %2 : vector<4x1xf32> to vector<4x128xf32>
    %4 = arith.mulf %1, %3 : vector<4x128xf32>
    %c0_4 = arith.constant 0 : index
    %c0_5 = arith.constant 0 : index
    %5 = vector.load %arg4[%c0_4, %c0_5] : memref<4x1xf32, #tpu.memory_space<vmem>>, vector<4x1xf32>
    %6 = vector.broadcast %5 : vector<4x1xf32> to vector<4x128xf32>
    %7 = arith.addf %4, %6 : vector<4x128xf32>
    %8 = tpu.iota {dimensions = array<i32: 1>} : vector<1x128xi32>
    %c16_i32 = arith.constant 16 : i32
    %c0_i32 = arith.constant 0 : i32
    %9 = arith.cmpi eq, %c16_i32, %c0_i32 : i32
    %c1_i32 = arith.constant 1 : i32
    %10 = arith.select %9, %c1_i32, %c16_i32 : i32
    %11 = vector.broadcast %10 : i32 to vector<1x128xi32>
    %12 = arith.remsi %8, %11 : vector<1x128xi32>
    %c0_i32_6 = arith.constant 0 : i32
    %13 = vector.broadcast %c0_i32_6 : i32 to vector<1x128xi32>
    %14 = arith.cmpi ne, %12, %13 : vector<1x128xi32>
    %c0_i32_7 = arith.constant 0 : i32
    %15 = vector.broadcast %c0_i32_7 : i32 to vector<1x128xi32>
    %16 = arith.cmpi slt, %12, %15 : vector<1x128xi32>
    %c0_i32_8 = arith.constant 0 : i32
    %17 = arith.cmpi slt, %10, %c0_i32_8 : i32
    %18 = vector.broadcast %17 : i1 to vector<1x128xi1>
    %19 = vector.broadcast %18 : vector<1x128xi1> to vector<1x128xi1>
    %20 = arith.xori %16, %19 : vector<1x128xi1>
    %21 = arith.andi %20, %14 : vector<1x128xi1>
    %22 = vector.broadcast %10 : i32 to vector<1x128xi32>
    %23 = arith.addi %12, %22 : vector<1x128xi32>
    %24 = arith.select %21, %23, %12 : vector<1x128xi1>, vector<1x128xi32>
    %cst = arith.constant 0.000000e+00 : f32
    %25 = vector.broadcast %cst : f32 to vector<8x128xf32>
    %c2_i32 = arith.constant 2 : i32
    %26 = tpu.dynamic_rotate %7 by %c2_i32 dim 1 : vector<4x128xf32>, i32 -> vector<4x128xf32>
    %c-2_i32 = arith.constant -2 : i32
    %27 = vector.broadcast %c-2_i32 : i32 to vector<1x128xi32>
    %28 = arith.addi %24, %27 : vector<1x128xi32>
    %c0_i32_9 = arith.constant 0 : i32
    %29 = vector.broadcast %c0_i32_9 : i32 to vector<1x128xi32>
    %30 = arith.cmpi sge, %28, %29 : vector<1x128xi32>
    %c16_i32_10 = arith.constant 16 : i32
    %31 = vector.broadcast %c16_i32_10 : i32 to vector<1x128xi32>
    %32 = arith.cmpi slt, %28, %31 : vector<1x128xi32>
    %33 = arith.andi %30, %32 : vector<1x128xi1>
    %cst_11 = arith.constant 0.000000e+00 : f32
    %34 = vector.shape_cast %33 : vector<1x128xi1> to vector<1x128xi1>
    %35 = vector.broadcast %34 : vector<1x128xi1> to vector<4x128xi1>
    %36 = vector.broadcast %cst_11 : f32 to vector<4x128xf32>
    %37 = arith.select %35, %26, %36 : vector<4x128xi1>, vector<4x128xf32>
    %c0_12 = arith.constant 0 : index
    %c0_13 = arith.constant 0 : index
    %c0_14 = arith.constant 0 : index
    %38 = vector.load %arg5[%c0_12, %c0_13, %c0_14] : memref<5x8x4xbf16, #tpu.memory_space<vmem>>, vector<1x8x4xbf16>
    %39 = vector.shape_cast %38 : vector<1x8x4xbf16> to vector<8x4xbf16>
    %40 = arith.truncf %37 : vector<4x128xf32> to vector<4x128xbf16>
    %cst_15 = arith.constant dense<0.000000e+00> : vector<8x128xf32>
    %41 = tpu.matmul %39, %40, %cst_15 {dimension_numbers = #tpu.dot_dimension_numbers<[1], [0], [0], [1], [0, 0, 1, 1], [], []>} : vector<8x4xbf16>, vector<4x128xbf16>, vector<8x128xf32> -> vector<8x128xf32>
    %42 = arith.addf %25, %41 : vector<8x128xf32>
    %c1_i32_16 = arith.constant 1 : i32
    %43 = tpu.dynamic_rotate %7 by %c1_i32_16 dim 1 : vector<4x128xf32>, i32 -> vector<4x128xf32>
    %c-1_i32 = arith.constant -1 : i32
    %44 = vector.broadcast %c-1_i32 : i32 to vector<1x128xi32>
    %45 = arith.addi %24, %44 : vector<1x128xi32>
    %c0_i32_17 = arith.constant 0 : i32
    %46 = vector.broadcast %c0_i32_17 : i32 to vector<1x128xi32>
    %47 = arith.cmpi sge, %45, %46 : vector<1x128xi32>
    %c16_i32_18 = arith.constant 16 : i32
    %48 = vector.broadcast %c16_i32_18 : i32 to vector<1x128xi32>
    %49 = arith.cmpi slt, %45, %48 : vector<1x128xi32>
    %50 = arith.andi %47, %49 : vector<1x128xi1>
    %cst_19 = arith.constant 0.000000e+00 : f32
    %51 = vector.shape_cast %50 : vector<1x128xi1> to vector<1x128xi1>
    %52 = vector.broadcast %51 : vector<1x128xi1> to vector<4x128xi1>
    %53 = vector.broadcast %cst_19 : f32 to vector<4x128xf32>
    %54 = arith.select %52, %43, %53 : vector<4x128xi1>, vector<4x128xf32>
    %c1 = arith.constant 1 : index
    %c0_20 = arith.constant 0 : index
    %c0_21 = arith.constant 0 : index
    %55 = vector.load %arg5[%c1, %c0_20, %c0_21] : memref<5x8x4xbf16, #tpu.memory_space<vmem>>, vector<1x8x4xbf16>
    %56 = vector.shape_cast %55 : vector<1x8x4xbf16> to vector<8x4xbf16>
    %57 = arith.truncf %54 : vector<4x128xf32> to vector<4x128xbf16>
    %cst_22 = arith.constant dense<0.000000e+00> : vector<8x128xf32>
    %58 = tpu.matmul %56, %57, %cst_22 {dimension_numbers = #tpu.dot_dimension_numbers<[1], [0], [0], [1], [0, 0, 1, 1], [], []>} : vector<8x4xbf16>, vector<4x128xbf16>, vector<8x128xf32> -> vector<8x128xf32>
    %59 = arith.addf %42, %58 : vector<8x128xf32>
    %c0_i32_23 = arith.constant 0 : i32
    %60 = vector.broadcast %c0_i32_23 : i32 to vector<1x128xi32>
    %61 = arith.addi %24, %60 : vector<1x128xi32>
    %c0_i32_24 = arith.constant 0 : i32
    %62 = vector.broadcast %c0_i32_24 : i32 to vector<1x128xi32>
    %63 = arith.cmpi sge, %61, %62 : vector<1x128xi32>
    %c16_i32_25 = arith.constant 16 : i32
    %64 = vector.broadcast %c16_i32_25 : i32 to vector<1x128xi32>
    %65 = arith.cmpi slt, %61, %64 : vector<1x128xi32>
    %66 = arith.andi %63, %65 : vector<1x128xi1>
    %cst_26 = arith.constant 0.000000e+00 : f32
    %67 = vector.shape_cast %66 : vector<1x128xi1> to vector<1x128xi1>
    %68 = vector.broadcast %67 : vector<1x128xi1> to vector<4x128xi1>
    %69 = vector.broadcast %cst_26 : f32 to vector<4x128xf32>
    %70 = arith.select %68, %7, %69 : vector<4x128xi1>, vector<4x128xf32>
    %c2 = arith.constant 2 : index
    %c0_27 = arith.constant 0 : index
    %c0_28 = arith.constant 0 : index
    %71 = vector.load %arg5[%c2, %c0_27, %c0_28] : memref<5x8x4xbf16, #tpu.memory_space<vmem>>, vector<1x8x4xbf16>
    %72 = vector.shape_cast %71 : vector<1x8x4xbf16> to vector<8x4xbf16>
    %73 = arith.truncf %70 : vector<4x128xf32> to vector<4x128xbf16>
    %cst_29 = arith.constant dense<0.000000e+00> : vector<8x128xf32>
    %74 = tpu.matmul %72, %73, %cst_29 {dimension_numbers = #tpu.dot_dimension_numbers<[1], [0], [0], [1], [0, 0, 1, 1], [], []>} : vector<8x4xbf16>, vector<4x128xbf16>, vector<8x128xf32> -> vector<8x128xf32>
    %75 = arith.addf %59, %74 : vector<8x128xf32>
    %c127_i32 = arith.constant 127 : i32
    %76 = tpu.dynamic_rotate %7 by %c127_i32 dim 1 : vector<4x128xf32>, i32 -> vector<4x128xf32>
    %c1_i32_30 = arith.constant 1 : i32
    %77 = vector.broadcast %c1_i32_30 : i32 to vector<1x128xi32>
    %78 = arith.addi %24, %77 : vector<1x128xi32>
    %c0_i32_31 = arith.constant 0 : i32
    %79 = vector.broadcast %c0_i32_31 : i32 to vector<1x128xi32>
    %80 = arith.cmpi sge, %78, %79 : vector<1x128xi32>
    %c16_i32_32 = arith.constant 16 : i32
    %81 = vector.broadcast %c16_i32_32 : i32 to vector<1x128xi32>
    %82 = arith.cmpi slt, %78, %81 : vector<1x128xi32>
    %83 = arith.andi %80, %82 : vector<1x128xi1>
    %cst_33 = arith.constant 0.000000e+00 : f32
    %84 = vector.shape_cast %83 : vector<1x128xi1> to vector<1x128xi1>
    %85 = vector.broadcast %84 : vector<1x128xi1> to vector<4x128xi1>
    %86 = vector.broadcast %cst_33 : f32 to vector<4x128xf32>
    %87 = arith.select %85, %76, %86 : vector<4x128xi1>, vector<4x128xf32>
    %c3 = arith.constant 3 : index
    %c0_34 = arith.constant 0 : index
    %c0_35 = arith.constant 0 : index
    %88 = vector.load %arg5[%c3, %c0_34, %c0_35] : memref<5x8x4xbf16, #tpu.memory_space<vmem>>, vector<1x8x4xbf16>
    %89 = vector.shape_cast %88 : vector<1x8x4xbf16> to vector<8x4xbf16>
    %90 = arith.truncf %87 : vector<4x128xf32> to vector<4x128xbf16>
    %cst_36 = arith.constant dense<0.000000e+00> : vector<8x128xf32>
    %91 = tpu.matmul %89, %90, %cst_36 {dimension_numbers = #tpu.dot_dimension_numbers<[1], [0], [0], [1], [0, 0, 1, 1], [], []>} : vector<8x4xbf16>, vector<4x128xbf16>, vector<8x128xf32> -> vector<8x128xf32>
    %92 = arith.addf %75, %91 : vector<8x128xf32>
    %c126_i32 = arith.constant 126 : i32
    %93 = tpu.dynamic_rotate %7 by %c126_i32 dim 1 : vector<4x128xf32>, i32 -> vector<4x128xf32>
    %c2_i32_37 = arith.constant 2 : i32
    %94 = vector.broadcast %c2_i32_37 : i32 to vector<1x128xi32>
    %95 = arith.addi %24, %94 : vector<1x128xi32>
    %c0_i32_38 = arith.constant 0 : i32
    %96 = vector.broadcast %c0_i32_38 : i32 to vector<1x128xi32>
    %97 = arith.cmpi sge, %95, %96 : vector<1x128xi32>
    %c16_i32_39 = arith.constant 16 : i32
    %98 = vector.broadcast %c16_i32_39 : i32 to vector<1x128xi32>
    %99 = arith.cmpi slt, %95, %98 : vector<1x128xi32>
    %100 = arith.andi %97, %99 : vector<1x128xi1>
    %cst_40 = arith.constant 0.000000e+00 : f32
    %101 = vector.shape_cast %100 : vector<1x128xi1> to vector<1x128xi1>
    %102 = vector.broadcast %101 : vector<1x128xi1> to vector<4x128xi1>
    %103 = vector.broadcast %cst_40 : f32 to vector<4x128xf32>
    %104 = arith.select %102, %93, %103 : vector<4x128xi1>, vector<4x128xf32>
    %c4 = arith.constant 4 : index
    %c0_41 = arith.constant 0 : index
    %c0_42 = arith.constant 0 : index
    %105 = vector.load %arg5[%c4, %c0_41, %c0_42] : memref<5x8x4xbf16, #tpu.memory_space<vmem>>, vector<1x8x4xbf16>
    %106 = vector.shape_cast %105 : vector<1x8x4xbf16> to vector<8x4xbf16>
    %107 = arith.truncf %104 : vector<4x128xf32> to vector<4x128xbf16>
    %cst_43 = arith.constant dense<0.000000e+00> : vector<8x128xf32>
    %108 = tpu.matmul %106, %107, %cst_43 {dimension_numbers = #tpu.dot_dimension_numbers<[1], [0], [0], [1], [0, 0, 1, 1], [], []>} : vector<8x4xbf16>, vector<4x128xbf16>, vector<8x128xf32> -> vector<8x128xf32>
    %109 = arith.addf %92, %108 : vector<8x128xf32>
    %c0_44 = arith.constant 0 : index
    %c0_45 = arith.constant 0 : index
    %110 = vector.load %arg6[%c0_44, %c0_45] : memref<8x1xf32, #tpu.memory_space<vmem>>, vector<8x1xf32>
    %111 = vector.broadcast %110 : vector<8x1xf32> to vector<8x128xf32>
    %112 = arith.addf %109, %111 : vector<8x128xf32>
    %cst_46 = arith.constant 0.000000e+00 : f32
    %113 = vector.broadcast %cst_46 : f32 to vector<8x128xf32>
    %114 = arith.maximumf %112, %113 : vector<8x128xf32>
    %c0_47 = arith.constant 0 : index
    %c0_48 = arith.constant 0 : index
    %115 = vector.load %arg7[%c0_47, %c0_48] : memref<8x4xbf16, #tpu.memory_space<vmem>>, vector<8x4xbf16>
    %116 = arith.truncf %1 : vector<4x128xf32> to vector<4x128xbf16>
    %cst_49 = arith.constant dense<0.000000e+00> : vector<8x128xf32>
    %117 = tpu.matmul %115, %116, %cst_49 {dimension_numbers = #tpu.dot_dimension_numbers<[1], [0], [0], [1], [0, 0, 1, 1], [], []>} : vector<8x4xbf16>, vector<4x128xbf16>, vector<8x128xf32> -> vector<8x128xf32>
    %c0_50 = arith.constant 0 : index
    %c0_51 = arith.constant 0 : index
    %118 = vector.load %arg8[%c0_50, %c0_51] : memref<8x1xf32, #tpu.memory_space<vmem>>, vector<8x1xf32>
    %119 = vector.broadcast %118 : vector<8x1xf32> to vector<8x128xf32>
    %120 = arith.addf %117, %119 : vector<8x128xf32>
    %121 = arith.addf %114, %120 : vector<8x128xf32>
    %c0_52 = arith.constant 0 : index
    %c0_53 = arith.constant 0 : index
    %c0_54 = arith.constant 0 : index
    %122 = vector.load %arg9[%c0_52, %c0_53, %c0_54] : memref<1x8x128xf32, #tpu.memory_space<vmem>>, vector<1x8x128xf32>
    %123 = vector.shape_cast %122 : vector<1x8x128xf32> to vector<8x128xf32>
    %124 = vector.shape_cast %121 : vector<8x128xf32> to vector<1x8x128xf32>
    tpu.vector_store %arg9[%c0_52, %c0_53, %c0_54], %124 {strides = array<i32>} : memref<1x8x128xf32, #tpu.memory_space<vmem>>, vector<1x8x128xf32>,
    return
  }
  func.func @transform_0(%arg0: i32, %arg1: i32) -> (i32, i32, i32) {
    %c0_i32 = arith.constant 0 : i32
    %c0_i32_0 = arith.constant 0 : i32
    return %arg0, %c0_i32, %arg1 : i32, i32, i32
  }
  func.func @transform_1(%arg0: i32, %arg1: i32) -> (i32, i32) {
    %c0_i32 = arith.constant 0 : i32
    %c0_i32_0 = arith.constant 0 : i32
    %c0_i32_1 = arith.constant 0 : i32
    return %c0_i32, %c0_i32_0 : i32, i32
  }
  func.func @transform_2(%arg0: i32, %arg1: i32) -> (i32, i32) {
    %c0_i32 = arith.constant 0 : i32
    %c0_i32_0 = arith.constant 0 : i32
    %c0_i32_1 = arith.constant 0 : i32
    return %c0_i32, %c0_i32_0 : i32, i32
  }
  func.func @transform_3(%arg0: i32, %arg1: i32) -> (i32, i32, i32) {
    %c0_i32 = arith.constant 0 : i32
    %c0_i32_0 = arith.constant 0 : i32
    %c0_i32_1 = arith.constant 0 : i32
    %c0_i32_2 = arith.constant 0 : i32
    return %c0_i32, %c0_i32_0, %c0_i32_1 : i32, i32, i32
  }
  func.func @transform_4(%arg0: i32, %arg1: i32) -> (i32, i32) {
    %c0_i32 = arith.constant 0 : i32
    %c0_i32_0 = arith.constant 0 : i32
    %c0_i32_1 = arith.constant 0 : i32
    return %c0_i32, %c0_i32_0 : i32, i32
  }
  func.func @transform_5(%arg0: i32, %arg1: i32) -> (i32, i32) {
    %c0_i32 = arith.constant 0 : i32
    %c0_i32_0 = arith.constant 0 : i32
    %c0_i32_1 = arith.constant 0 : i32
    return %c0_i32, %c0_i32_0 : i32, i32
  }
  func.func @transform_6(%arg0: i32, %arg1: i32) -> (i32, i32) {
    %c0_i32 = arith.constant 0 : i32
    %c0_i32_0 = arith.constant 0 : i32
    %c0_i32_1 = arith.constant 0 : i32
    return %c0_i32, %c0_i32_0 : i32, i32
  }
  func.func @transform_7(%arg0: i32, %arg1: i32) -> (i32, i32, i32) {
    %c0_i32 = arith.constant 0 : i32
    %c0_i32_0 = arith.constant 0 : i32
    return %arg0, %c0_i32, %arg1 : i32, i32, i32
  }
}

</mosaic_0001>

<bundles_post_ra>
// kernel: tpu_custom_call.1
= control target key start
LH: loop header
LB: loop body
LE: loop exit
PB: predicated region body
PF: predicated region fallthrough
CT: control target
= control target key end

     0   :  { %12 = vsyncpa [#allocation3], 0  ;;  %s1208_s0 = inlined_call_operand.vmem [shape: f32[2,4,128], index: 0, kind: input, shape index: {}]   ;;  %s1209_s1 = inlined_call_operand.vmem [shape: f32[4,1], index: 1, kind: input, shape index: {}]   ;;  %s1210_s2 = inlined_call_operand.vmem [shape: f32[4,1], index: 2, kind: input, shape index: {}]   ;;  %s1211_s3 = inlined_call_operand.vmem [shape: bf16[5,8,4], index: 3, kind: input, shape index: {}]   ;;  %s1212_s4 = inlined_call_operand.vmem [shape: f32[8,1], index: 4, kind: input, shape index: {}]   ;;  %s1213_s5 = inlined_call_operand.vmem [shape: bf16[8,4], index: 5, kind: input, shape index: {}]   ;;  %s1214_s6 = inlined_call_operand.vmem [shape: f32[8,1], index: 6, kind: input, shape index: {}]   ;;  %s1215_s7 = inlined_call_operand.hbm [shape: f32[2,8,128], index: 7, kind: output, shape index: {}]  }
   0x1   :  { %14 = vsyncpa [#allocation3 + $0x1], 0  ;;  %s1031_s24 = smov 0   ;;  %s1033_s25 = smov 0  }
   0x2   :  { %s1035_s26 = smov 0   ;;  %s1037_s27 = smov 0  }
   0x3   :  { %s1039_s28 = smov 0   ;;  %s1041_s29 = smov 0  }
   0x4 LB: > { %s770_s30 = sadd.s32 4294967295, %s981_s29   ;;  %s771_s8 = sadd.s32 4294967294, %s981_s29   ;;  %s981_s29 = sphi %s1041_s29, %s20_s29   ;;  %s977_s28 = sphi %s1039_s28, %s1222_s28   ;;  %s973_s27 = sphi %s1037_s27, %s1221_s27   ;;  %s969_s26 = sphi %s1035_s26, %s1220_s26   ;;  %s965_s25 = sphi %s1033_s25, %s1219_s25   ;;  %s961_s24 = sphi %s1031_s24, %s1218_s24  }
   0x5   : > { %s32_s9 = sadd.s32 1, %s977_s28  ;;  %s195_s10 = sadd.s32 1, %s969_s26 }
   0x6   : > { %p34_p0 = scmp.ge.s32.totalorder %s32_s9, 2  ;;  %p205_p1 = scmp.ne.s32.totalorder %s969_s26, %s965_s25 }
   0x7   : > { %p206_p2 = scmp.eq.s32.totalorder %s770_s30, 1  ;;  %p211_p3 = scmp.ne.s32.totalorder %s965_s25, %s961_s24 }
   0x8   : > { %s1224_s9 = smov (%p34_p0, %s32_s9), 0  ;;  %p212_p5 = scmp.eq.s32.totalorder %s771_s8, 1 }
   0x9   : > { %p1071_p4 = por %p206_p2, %p205_p1  ;;  %s190_s12 = ssub.s32 %s977_s28, %s1224_s9 }
   0xa   : > { %p774_p6 = scmp.ge.s32.totalorder %s981_s29, 1  ;;  %p193_p7 = scmp.eq.s32.totalorder %s190_s12, 0 }
   0xb   : > { %p1078_p8 = por %p212_p5, %p211_p3  ;;  %p258_p9 = scmp.lt.s32.totalorder %s981_s29, 3 }
   0xc   : > { %s1084_s14 = scalar_select %p193_p7, %s969_s26, %s195_s10  }
   0xd   : > { %p259_p10 = pnand %p774_p6, %p258_p9 }
   0xe   : > { %v301_v0 = vld [vmem:[%s1209_s1] sm:$0xf] (!%p259_p10)  ;;  %v983_v1 = vmov (!%p259_p10), 0   ;;  %p292_p11 = scmp.lt.s32.totalorder (!%p259_p10), %s973_s27, 1  ;;  %v984_v3 = vmov (!%p259_p10), 0.0   ;;  %vm985_vm0 = vmmov (!%p259_p10), 0   ;;  %v315_v11 = vlaneseq (!%p259_p10) }
   0xf   : > { %262 = sbr.rel (%p259_p10) target bundleno = 522 (0x20a), region = 48  ;;  %901 = vset.pattern.permute.xlu0 (!%p259_p10), %v983_v1  ;;  %902 = vset.pattern.permute.xlu1 (!%p259_p10), %v983_v1  ;;  %v308_v2 = vld [vmem:[%s1210_s2] sm:$0xf] (!%p259_p10)  ;;  %s986_s30 = smov (!%p259_p10), 127   ;;  %vm356_vm4 = vcmask (!%p259_p10), 1041408   ;;  %vm352_vm5 = vcmask (!%p259_p10), 31744  }
  0x10   : > { %304 = vperm.xlu0 (!%p259_p10), %901, %v301_v0   ;;  %803 = vmatprep.subr.bf16.mxu0 (!%p259_p10), %v984_v3  ;;  %s987_s8 = smov (!%p259_p10), 1   ;;  %v620_v9 = vld [vmem:[%s1212_s4] sm:$0xff] (!%p259_p10)  ;;  %s988_s15 = smov (!%p259_p10), 2   ;;  %v316_v12 = vand.u32 (!%p259_p10), 127, %v315_v11  ;;  %v780_v37 = vld [vmem:[%s1211_s3 + $0x8] sm:$0xf] (!%p259_p10) }
  0x11   : > { %809 = vmatprep.subr.bf16.mxu1 (!%p259_p10), %v984_v3  ;;  %805 = vmatprep.mubr.msk.bf16.mxu0 (!%p259_p10), %vm985_vm0, %v984_v3  ;;  %s989_s16 = smov (!%p259_p10), 126   ;;  %v630_v10 = vld [vmem:[%s1214_s6] sm:$0xff] (!%p259_p10)  ;;  %v782_v40 = vld [vmem:[%s1211_s3 + $0xc] sm:$0xf] (!%p259_p10)  ;;  %v784_v42 = vld [vmem:[%s1211_s3 + $0x10] sm:$0xf] (!%p259_p10) }
  0x12   : > { %811 = vmatprep.mubr.msk.bf16.mxu1 (!%p259_p10), %vm985_vm0, %v984_v3  ;;  %v321_v13 = vand.u32 (!%p259_p10), 15, %v316_v12  ;;  %v777_v27 = vld [vmem:[%s1211_s3 + $0x4] sm:$0xf] (!%p259_p10)  ;;  %v338_v34 = vld [vmem:[%s1211_s3] sm:$0xf] (!%p259_p10)  ;;  %s289_s18 = sand.u32 (!%p259_p10), 1, %s965_s25  }
  0x13   : > { %v628_v43 = vld [vmem:[%s1213_s5] sm:$0xf] (!%p259_p10)  ;;  %s990_s12 = smov (!%p259_p10), [#allocation2]  }
  0x14   : > { %311 = vperm.xlu0 (!%p259_p10), %901, %v308_v2   ;;  %v342_v14 = vadd.s32 (!%p259_p10), 4294967295, %v321_v13  ;;  %v504_v15 = vadd.s32 (!%p259_p10), 1, %v321_v13  ;;  %v331_v16 = vadd.s32 (!%p259_p10), 4294967294, %v321_v13  ;;  %v563_v21 = vadd.s32 (!%p259_p10), 2, %v321_v13 }
  0x16   : > { %s293_s19 = scalar_select %p292_p11, %s973_s27, 1  ;;  %vm343_vm1 = vcmp.ge.s32.totalorder %v342_v14, 0  ;;  %vm506_vm2 = vcmp.lt.s32.totalorder %v504_v15, 16  ;;  %vm332_vm3 = vcmp.ge.s32.totalorder %v331_v16, 0  ;;  %vm565_vm6 = vcmp.lt.s32.totalorder %v563_v21, 16 }
  0x18   : > { %s776_s20 = sshll.u32 %s293_s19, 2  ;;  %s775_s19 = sshll.u32 %s289_s18, 3 }
  0x19   : > { %s298_s23 = scalar_lea.vmem %s1208_s0, %s776_s20  ;;  %s788_s20 = sshll.u32 %s973_s27, 7 }
  0x1a   : > { %v1099_v5 = vld [vmem:[%s298_s23] sm:$0xf]  ;;  %s291_s21 = scalar_lea.vmem [#allocation2], %s775_s19  ;;  %s685_s27 = scalar_lea.sflag [#allocation3], %s289_s18 }
  0x1b   : > { %v629_v38 = vpack.c.bf16 %v1099_v5, %v1099_v5  ;;  %s699_s22 = sshll.u32 %s291_s21, 4  ;;  %s1163_s22 = int_to_ptr.vmem [resolvable:$true] %s699_s22 }
  0x1c   : > { %s903_s10 = scalar_lea.vmem %s1163_s22, 128 }
  0x1d   : > { %v640_v41 = vsel %vm356_vm4, %v629_v38, 0  ;;  %p904_p12 = scmp.ne.s32.totalorder %s1163_s22, %s903_s10 }
  0x1f   : > { %p905_p13 = pnand %p904_p12, %p1071_p4 }
  0x21   : > { %p906_p0 = pneg %p905_p13 }
  0x8f   : > { %v305_v4 = vpop.permute.xlu0 %304 }
  0x90   : > { %v307_v6 = vmul.f32 %v305_v4, %v1099_v5 }
  0x93   : > { %v312_v7 = vpop.permute.xlu0 %311 }
  0x94   : > { %v314_v8 = vadd.f32 %v312_v7, %v307_v6 }
  0x96   : > { %502 = vrot.lane.b32.xlu0 %v314_v8, %s986_s30  ;;  %340 = vrot.lane.b32.xlu1 %v314_v8, %s987_s8  ;;  %v454_v24 = vpack.c.bf16 %v314_v8, %v314_v8  ;;  %s1161_s8 = scalar_lea.hbm %s1215_s7, %s788_s20 }
  0x98   : > { %v459_v32 = vsel %vm356_vm4, %v454_v24, 0 }
  0x9a   : > { %623 = vperm.xlu0 %901, %v620_v9   ;;  %329 = vrot.lane.b32.xlu1 %v314_v8, %s988_s15  ;;  %s907_s15 = sshll.u32 %s990_s12, 4  ;;  %s908_s15 = int_to_ptr.vmem [resolvable:$false] %s907_s15 }
  0x9b   : > { %p910_p1 = scmp.lt.s32.totalorder %s1163_s22, %s908_s15 }
  0x9e   : > { %561 = vrot.lane.b32.xlu1 %v314_v8, %s989_s16  ;;  %s909_s16 = scalar_lea.vmem %s908_s15, 256 }
  0x9f   : > { %p911_p2 = scmp.lt.s32.totalorder %s909_s16, %s903_s10 }
  0xa1   : > { %p912_p3 = por %p911_p2, %p910_p1 }
  0xa2   : > { %633 = vperm.xlu1 %902, %v630_v10  }
  0xa3   : > { %p913_p5 = pnand %p912_p3, %p906_p0 }
 0x108   : > { %v341_v17 = vpop.permute.xlu1 %340  ;;  %v503_v19 = vpop.permute.xlu0 %502 }
 0x109   : > { %v348_v18 = vsel %vm343_vm1, %v341_v17, 0.0  ;;  %v510_v25 = vsel %vm506_vm2, %v503_v19, 0.0 }
 0x10a   : > { %v351_v20 = vpack.c.bf16 %v348_v18, %v348_v18  ;;  %v513_v29 = vpack.c.bf16 %v510_v25, %v510_v25 }
 0x10c   : > { %v330_v22 = vpop.permute.xlu1 %329  ;;  %v358_v23 = vsel %vm356_vm4, %v351_v20, 0  ;;  %v518_v35 = vsel %vm356_vm4, %v513_v29, 0 }
 0x10d   : > { %v337_v26 = vsel %vm332_vm3, %v330_v22, 0.0  ;;  %804 = vmatpush3.bf16.msra.mxu0 %v358_v23 }
 0x10e   : > { %v339_v28 = vpack.c.bf16 %v337_v26, %v337_v26  ;;  %815 = vmatprep.subr.bf16.mxu0 %v984_v3 }
 0x110   : > { %806 = vmatmul.mubr.msk.bf16.vlgmr.msra.gmra.mrb[0].mxu0 %vm352_vm5, %v777_v27  ;;  %v562_v30 = vpop.permute.xlu1 %561  ;;  %v404_v31 = vsel %vm356_vm4, %v339_v28, 0 }
 0x111   : > { %v569_v33 = vsel %vm565_vm6, %v562_v30, 0.0  ;;  %810 = vmatpush3.bf16.msra.mxu1 %v404_v31  ;;  %816 = vmatpush3.bf16.msra.mxu0 %v459_v32 }
 0x112   : > { %821 = vmatprep.subr.bf16.mxu1 %v984_v3  ;;  %817 = vmatprep.mubr.msk.bf16.mxu0 %vm985_vm0, %v984_v3  ;;  %v572_v36 = vpack.c.bf16 %v569_v33, %v569_v33 }
 0x113   : > { %827 = vmatprep.subr.bf16.mxu0 %v984_v3 }
 0x114   : > { %812 = vmatmul.mubr.msk.bf16.vlgmr.msra.gmra.mrb[0].mxu1 %vm352_vm5, %v338_v34  ;;  %v577_v39 = vsel %vm356_vm4, %v572_v36, 0 }
 0x115   : > { %822 = vmatpush3.bf16.msra.mxu1 %v518_v35  ;;  %823 = vmatprep.mubr.msk.bf16.mxu1 %vm985_vm0, %v984_v3 }
 0x116   : > { %833 = vmatprep.subr.bf16.mxu1 %v984_v3 }
 0x118   : > { %818 = vmatmul.mubr.msk.bf16.vlgmr.msra.gmra.mrb[4].mxu0 %vm352_vm5, %v780_v37 }
 0x119   : > { %828 = vmatpush3.bf16.msra.mxu0 %v577_v39  ;;  %829 = vmatprep.mubr.msk.bf16.mxu0 %vm985_vm0, %v984_v3  ;;  %v624_v0 = vpop.permute.xlu0 %623 }
 0x11c   : > { %824 = vmatmul.mubr.msk.bf16.vlgmr.msra.gmra.mrb[4].mxu1 %vm352_vm5, %v782_v40 }
 0x11d   : > { %834 = vmatpush3.bf16.msra.mxu1 %v640_v41  ;;  %835 = vmatprep.mubr.msk.bf16.mxu1 %vm985_vm0, %v984_v3 }
 0x120   : > { %830 = vmatmul.mubr.msk.bf16.vlgmr.msra.gmra.mrb[8].mxu0 %vm352_vm5, %v784_v42 }
 0x121   : > { %v634_v4 = vpop.permute.xlu1 %633 }
 0x124   : > { %836 = vmatmul.mubr.msk.bf16.vlgmr.msra.gmra.mrb[8].mxu1 %vm352_vm5, %v628_v43 }
 0x1e3   : > { %v394_v44 = vpop.f32.mrb[0].mxu0 }
 0x1e4   : > { %v807_v45 = vpop.f32.mrb[1].mxu0 }
 0x1e5   : > { %v397_v46 = vpop.f32.mrb[2].mxu0 }
 0x1e6   : > { %v808_v47 = vpop.f32.mrb[3].mxu0 }
 0x1e7   : > { %v440_v48 = vpop.f32.mrb[0].mxu1 }
 0x1e8   : > { %v441_v49 = vadd.f32 %v440_v48, %v394_v44  ;;  %v813_v50 = vpop.f32.mrb[1].mxu1 }
 0x1e9   : > { %v443_v51 = vpop.f32.mrb[2].mxu1 }
 0x1ea   : > { %v814_v52 = vpop.f32.mrb[3].mxu1 }
 0x1eb   : > { %v495_v53 = vpop.f32.mrb[4].mxu0 }
 0x1ec   : > { %v501_v54 = vadd.f32 %v495_v53, %v441_v49  ;;  %v819_v55 = vpop.f32.mrb[5].mxu0 }
 0x1ed   : > { %v498_v56 = vpop.f32.mrb[6].mxu0 }
 0x1ee   : > { %v820_v57 = vpop.f32.mrb[7].mxu0 }
 0x1ef   : > { %v554_v58 = vpop.f32.mrb[4].mxu1 }
 0x1f0   : > { %v560_v59 = vadd.f32 %v554_v58, %v501_v54  ;;  %v825_v60 = vpop.f32.mrb[5].mxu1 }
 0x1f1   : > { %v557_v61 = vpop.f32.mrb[6].mxu1 }
 0x1f2   : > { %v826_v62 = vpop.f32.mrb[7].mxu1 }
 0x1f3   : > { %v613_v63 = vpop.f32.mrb[8].mxu0 }
 0x1f4   : > { %v619_v1 = vadd.f32 %v613_v63, %v560_v59  ;;  %v831_v2 = vpop.f32.mrb[9].mxu0 }
 0x1f5   : > { %v616_v3 = vpop.f32.mrb[10].mxu0 }
 0x1f6   : > { %v626_v5 = vadd.f32 %v624_v0, %v619_v1  ;;  %v832_v6 = vpop.f32.mrb[11].mxu0 }
 0x1f7   : > { %v676_v7 = vpop.f32.mrb[8].mxu1 }
 0x1f8   : > { %v627_v8 = vmax.f32 %v626_v5, 0.0  ;;  %v677_v9 = vadd.f32 %v676_v7, %v634_v4  ;;  %v837_v10 = vpop.f32.mrb[9].mxu1 }
 0x1f9   : > { %v679_v11 = vpop.f32.mrb[10].mxu1 }
 0x1fa   : > { %v682_v12 = vadd.f32 %v677_v9, %v627_v8  ;;  %v838_v13 = vpop.f32.mrb[11].mxu1 }
 0x1fc   : > { %683 = vst [vmem:[%s291_s21] sm:$0xff] %v682_v12 }
 0x1fd   : > { %916 = shalt.err (!%p913_p5)
}
 0x1fe   : > { %s917_s17 = scalar_lea.hbm %s1161_s8, 128  ;;  %s921_s20 = scalar_lea.hbm %s1215_s7, 256 }
 0x1ff   : > { %p918_p6 = scmp.ne.s32.totalorder %s1161_s8, %s917_s17  ;;  %p922_p10 = scmp.lt.u32.totalorder %s1161_s8, %s1215_s7 }
 0x200   : > { %p923_p11 = scmp.lt.u32.totalorder %s921_s20, %s917_s17  ;;  %p925_p13 = scmp.lt.u32.totalorder %s917_s17, %s1161_s8 }
 0x201   : > { %p919_p7 = pnand %p918_p6, %p1071_p4 }
 0x202   : > { %p924_p12 = por %p923_p11, %p922_p10 }
 0x203   : > { %p920_p9 = pneg %p919_p7 }
 0x204   : > { %p926_p0 = por %p925_p13, %p924_p12 }
 0x206   : > { %p927_p1 = pnand %p926_p0, %p920_p9 }
 0x208   : > { %930 = shalt.err (!%p927_p1)
}
 0x209   : > { %839 = dma.vmem_to_hbm [thread:$0]  (%p1071_p4), %s1163_s22, 128, %s1161_s8, %s685_s27  }
 0x20a PF: > { %p845_p2 = scmp.ge.s32.totalorder %s981_s29, 2  ;;  %s711_s30 = sand.u32 1, %s961_s24  }
 0x20b   : > { %s712_s10 = scalar_lea.sflag [#allocation3], %s711_s30 }
 0x20c   : > { %p842_p3 = pnand %p845_p2, %p1078_p8 }
 0x20e   : > { %956 = dma.done.wait (!%p842_p3), %s712_s10, 128  }
 0x20f   : > { %958 = vsyncadd (!%p842_p3), %s712_s10, 4294967168  ;;  %s20_s29 = sadd.s32 1, %s981_s29   ;;  %s1218_s24 = smov %s965_s25 }
 0x210   : > { %p17_p5 = scmp.ge.s32.totalorder %s20_s29, 4   ;;  %s1219_s25 = smov %s969_s26 }
 0x211   : > { %s1220_s26 = smov %s1084_s14  ;;  %s1221_s27 = smov %s977_s28 }
 0x212   : > { %s1222_s28 = smov %s1224_s9  ;;  %19 = sbr.rel (!%p17_p5) target bundleno = 4 (0x4), region = 87 }
 0x219   :  { %717 = vsyncpa [#allocation3], 1 }
 0x21a   :  { %719 = vsyncpa [#allocation3 + $0x1], 1 }

</bundles_post_ra>
